<compile_context>
chip_gen: v7x
topology: tpu7x:2x2x1
jax: 0.10.0
libtpu: 0.0.40
codegen_flags: <defaults>
</compile_context>

<pallas_src>
import jax
import jax.numpy as jnp
from jax.experimental import pallas as pl
from jax.experimental.pallas import tpu as pltpu


_LANE = 128
_SUBLANE = 8
_TARGET_TILE_BYTES = 2 * 1024 * 1024      # per input buffer (double-buffered)
_VMEM_LIMIT_BYTES = 48 * 1024 * 1024      # safe on v5e/v6e (128 MiB) and v7x (64 MiB)


def _softmax_lastaxis(scores):
    """Numerically-stable softmax over the last (lane) axis; scores is f32."""
    m = jnp.max(scores, axis=-1, keepdims=True)
    e = jnp.exp(scores - m)
    denom = jnp.sum(e, axis=-1, keepdims=True)
    inv = pl.reciprocal(denom, approx=True)       # EUP vrcp slot (essentially free)
    inv = inv * (2.0 - denom * inv)               # one Newton step -> ~f32 accurate
    return e * inv


def _attn_kernel_seq_lanes(x_ref, v_ref, o_ref):
    """D < 128 path: sequence on lanes.

    x_ref: (Bb, D, S)  encoder outputs, pre-transposed in the wrapper
    v_ref: (D, 1)      attention vector (broadcast over lanes)
    o_ref: (Bb, 1, S)  lane-dense softmax weights
    """
    t = jnp.tanh(x_ref[...])                                  # (Bb, D, S)
    w = t * v_ref[...][None, :, :]                            # lane broadcast of v
    scores = jnp.sum(w, axis=1, keepdims=True).astype(jnp.float32)  # (Bb, 1, S)
    o_ref[...] = _softmax_lastaxis(scores).astype(o_ref.dtype)


def _attn_kernel_feat_lanes(x_ref, v_ref, o_ref):
    """D >= 128 path: feature on lanes (standard layout).

    x_ref: (Bb, S, D)
    v_ref: (1, D)
    o_ref: (Bb, S)     lane-dense softmax weights
    """
    t = jnp.tanh(x_ref[...])                                  # (Bb, S, D)
    w = t * v_ref[...][None, :, :]
    scores = jnp.sum(w, axis=-1).astype(jnp.float32)          # (Bb, S)
    o_ref[...] = _softmax_lastaxis(scores).astype(o_ref.dtype)


def _batch_block_seq_lanes(B, S, D, itemsize):
    """Batch rows per block for the (Bb, D, S) layout (no sublane constraint on Bb)."""
    bb = max(1, _TARGET_TILE_BYTES // (S * D * itemsize))
    if bb >= B:
        # Whole batch fits a single block; still split into 2 grid steps so
        # v7x's two TensorCores both get work (near-free elsewhere).
        return max(1, pl.cdiv(B, 2)) if B > 1 else 1
    return min(bb, B)


def _batch_block_feat_lanes(B, S, D, itemsize):
    """Batch rows per block for the (Bb, S) output layout (Bb is a sublane dim)."""
    bb = max(1, _TARGET_TILE_BYTES // (S * D * itemsize))
    if bb >= B:
        return B
    bb = max(_SUBLANE, (bb // _SUBLANE) * _SUBLANE)   # keep (Bb, S) tile-aligned
    return min(bb, B)


def attention_forward(encoder_outputs, v):
    """encoder_outputs: (B, S, D); v: (D,).  Returns softmax weights (B, S, 1)."""
    B, S, D = encoder_outputs.shape
    dtype = encoder_outputs.dtype
    itemsize = jnp.dtype(dtype).itemsize

    compiler_params = pltpu.CompilerParams(
        dimension_semantics=("parallel",),
        vmem_limit_bytes=_VMEM_LIMIT_BYTES,
    )

    # TODO(synk): softmax assumes the full sequence S lives in one block; very
    # large S*D would require an online / two-pass softmax over a tiled S axis.

    if D < _LANE:
        # Sequence on lanes: lane-dense tanh/mul, sublane (XLU) reduce over D,
        # and a naturally lane-dense output.
        bb = _batch_block_seq_lanes(B, S, D, itemsize)
        x_t = jnp.transpose(encoder_outputs, (0, 2, 1))       # (B, D, S) one-time
        probs = pl.pallas_call(
            _attn_kernel_seq_lanes,
            out_shape=jax.ShapeDtypeStruct((B, 1, S), dtype),
            grid=(pl.cdiv(B, bb),),
            in_specs=[
                pl.BlockSpec((bb, D, S), lambda b: (b, 0, 0)),
                pl.BlockSpec((D, 1), lambda b: (0, 0)),
            ],
            out_specs=pl.BlockSpec((bb, 1, S), lambda b: (b, 0, 0)),
            compiler_params=compiler_params,
        )(x_t, v.reshape(D, 1).astype(dtype))
        # (B, 1, S) -> (B, S, 1): same linear layout, free reshape in the wrapper.
        return probs.reshape(B, S, 1)

    # Feature on lanes (D >= 128): lane reduce over D, lane-dense (Bb, S) output.
    bb = _batch_block_feat_lanes(B, S, D, itemsize)
    probs = pl.pallas_call(
        _attn_kernel_feat_lanes,
        out_shape=jax.ShapeDtypeStruct((B, S), dtype),
        grid=(pl.cdiv(B, bb),),
        in_specs=[
            pl.BlockSpec((bb, S, D), lambda b: (b, 0, 0)),
            pl.BlockSpec((1, D), lambda b: (0, 0)),
        ],
        out_specs=pl.BlockSpec((bb, S), lambda b: (b, 0)),
        compiler_params=compiler_params,
    )(encoder_outputs, v.reshape(1, D).astype(dtype))
    return probs[..., None]


def attention_reference(encoder_outputs, v):
    """Pure-JAX reference mirroring the PyTorch forward."""
    x = jnp.tanh(encoder_outputs)                       # (B, S, D)
    scores = jnp.einsum("bsd,d->bs", x, v)              # (B, S)
    return jax.nn.softmax(scores, axis=1)[..., None]    # (B, S, 1)


if __name__ == "__main__":
    key = jax.random.PRNGKey(0)

    # (B, S, D) cases: primary small case (D < 128 path) + a D >= 128 case so
    # both kernel layouts are exercised.
    cases = [
        (2, 8, 32),
        (3, 16, 128),
    ]

    for (B, S, D) in cases:
        key, k_x, k_v = jax.random.split(key, 3)
        encoder_outputs = jax.random.normal(k_x, (B, S, D), dtype=jnp.float32)
        v = jax.random.normal(k_v, (D,), dtype=jnp.float32)   # torch.randn(v_size)

        out = attention_forward(encoder_outputs, v)
        out = jax.block_until_ready(out)

        ref = attention_reference(encoder_outputs, v)
        assert out.shape == (B, S, 1), out.shape
        assert jnp.allclose(out, ref, atol=1e-5, rtol=1e-5), (
            f"mismatch vs reference for shape {(B, S, D)}"
        )

    print("KERNEL_OK")
</pallas_src>

<mosaic_0001>
module attributes {stable_mosaic.version = 11 : i64} {
  func.func @_attn_kernel_seq_lanes(%arg0: i32, %arg1: memref<1x32x8xf32, #tpu.memory_space<vmem>>, %arg2: memref<32x1xf32, #tpu.memory_space<vmem>>, %arg3: memref<1x1x8xf32, #tpu.memory_space<vmem>>) attributes {dimension_semantics = [#tpu.dimension_semantics<parallel>], iteration_bounds = array<i64: 2>, scalar_prefetch = 0 : i64, scratch_operands = 0 : i64, tpu.core_type = #tpu.core_type<tc>, window_params = [{transform_indices = @transform_0, window_bounds = array<i64: 1, 32, 8>}, {pipeline_mode = #tpu.pipeline_mode<synchronous>, transform_indices = @transform_1, window_bounds = array<i64: 32, 1>}, {transform_indices = @transform_2, window_bounds = array<i64: 1, 1, 8>}]} {
    %c0 = arith.constant 0 : index
    %c0_0 = arith.constant 0 : index
    %c0_1 = arith.constant 0 : index
    %0 = vector.load %arg1[%c0, %c0_0, %c0_1] : memref<1x32x8xf32, #tpu.memory_space<vmem>>, vector<1x32x8xf32>
    %1 = math.tanh %0 : vector<1x32x8xf32>
    %c0_2 = arith.constant 0 : index
    %c0_3 = arith.constant 0 : index
    %2 = vector.load %arg2[%c0_2, %c0_3] : memref<32x1xf32, #tpu.memory_space<vmem>>, vector<32x1xf32>
    %3 = vector.shape_cast %2 : vector<32x1xf32> to vector<1x32x1xf32>
    %4 = vector.broadcast %3 : vector<1x32x1xf32> to vector<1x32x8xf32>
    %5 = arith.mulf %1, %4 : vector<1x32x8xf32>
    %cst = arith.constant dense<0.000000e+00> : vector<1x8xf32>
    %6 = vector.multi_reduction <add>, %5, %cst [1] : vector<1x32x8xf32> to vector<1x8xf32>
    %7 = vector.shape_cast %6 : vector<1x8xf32> to vector<1x1x8xf32>
    %cst_4 = arith.constant dense<0xFF800000> : vector<1x1xf32>
    %8 = vector.multi_reduction <maximumf>, %7, %cst_4 [2] : vector<1x1x8xf32> to vector<1x1xf32>
    %9 = vector.shape_cast %8 : vector<1x1xf32> to vector<1x1x1xf32>
    %10 = vector.broadcast %9 : vector<1x1x1xf32> to vector<1x1x8xf32>
    %11 = arith.subf %7, %10 : vector<1x1x8xf32>
    %12 = math.exp %11 : vector<1x1x8xf32>
    %cst_5 = arith.constant dense<0.000000e+00> : vector<1x1xf32>
    %13 = vector.multi_reduction <add>, %12, %cst_5 [2] : vector<1x1x8xf32> to vector<1x1xf32>
    %14 = vector.shape_cast %13 : vector<1x1xf32> to vector<1x1x1xf32>
    %15 = tpu.reciprocal %14 {approx = true} : vector<1x1x1xf32> -> vector<1x1x1xf32>
    %16 = arith.mulf %14, %15 : vector<1x1x1xf32>
    %cst_6 = arith.constant 2.000000e+00 : f32
    %17 = vector.broadcast %cst_6 : f32 to vector<1x1x1xf32>
    %18 = arith.subf %17, %16 : vector<1x1x1xf32>
    %19 = arith.mulf %15, %18 : vector<1x1x1xf32>
    %20 = vector.broadcast %19 : vector<1x1x1xf32> to vector<1x1x8xf32>
    %21 = arith.mulf %12, %20 : vector<1x1x8xf32>
    %c0_7 = arith.constant 0 : index
    %c0_8 = arith.constant 0 : index
    %c0_9 = arith.constant 0 : index
    %22 = vector.load %arg3[%c0_7, %c0_8, %c0_9] : memref<1x1x8xf32, #tpu.memory_space<vmem>>, vector<1x1x8xf32>
    tpu.vector_store %arg3[%c0_7, %c0_8, %c0_9], %21 {strides = array<i32>} : memref<1x1x8xf32, #tpu.memory_space<vmem>>, vector<1x1x8xf32>,
    return
  }
  func.func @transform_0(%arg0: i32) -> (i32, i32, i32) {
    %c0_i32 = arith.constant 0 : i32
    %c0_i32_0 = arith.constant 0 : i32
    %c0_i32_1 = arith.constant 0 : i32
    return %arg0, %c0_i32, %c0_i32_0 : i32, i32, i32
  }
  func.func @transform_1(%arg0: i32) -> (i32, i32) {
    %c0_i32 = arith.constant 0 : i32
    %c0_i32_0 = arith.constant 0 : i32
    %c0_i32_1 = arith.constant 0 : i32
    return %c0_i32, %c0_i32_0 : i32, i32
  }
  func.func @transform_2(%arg0: i32) -> (i32, i32, i32) {
    %c0_i32 = arith.constant 0 : i32
    %c0_i32_0 = arith.constant 0 : i32
    %c0_i32_1 = arith.constant 0 : i32
    return %arg0, %c0_i32, %c0_i32_0 : i32, i32, i32
  }
}

</mosaic_0001>

<bundles_post_ra>
// kernel: tpu_custom_call.1
= control target key start
LH: loop header
LB: loop body
LE: loop exit
PB: predicated region body
PF: predicated region fallthrough
CT: control target
= control target key end

     0   :  { %7 = vsyncpa [#allocation3], 0  ;;  %s538_s0 = inlined_call_operand.vmem [shape: f32[2,32,8], index: 0, kind: input, shape index: {}]   ;;  %s539_s1 = inlined_call_operand.vmem [shape: f32[32,1], index: 1, kind: input, shape index: {}]   ;;  %s540_s2 = inlined_call_operand.hbm [shape: f32[2,1,8], index: 2, kind: output, shape index: {}]  }
   0x1   :  { %9 = vsyncpa [#allocation3 + $0x1], 0  ;;  %s420_s9 = smov 0   ;;  %s422_s10 = smov 0  }
   0x2   :  { %s424_s11 = smov 0   ;;  %s426_s12 = smov 0  }
   0x3 LB: > { %s441_s13 = sadd.s32 4294967295, %s401_s12   ;;  %s275_s14 = sadd.s32 4294967294, %s401_s12   ;;  %s401_s12 = sphi %s426_s12, %s546_s12   ;;  %s397_s11 = sphi %s424_s11, %s545_s11   ;;  %s393_s10 = sphi %s422_s10, %s544_s10   ;;  %s389_s9 = sphi %s420_s9, %s543_s9  }
   0x4   : > { %s445_s15 = sadd.s32 1, %s401_s12   ;;  %s69_s16 = sadd.s32 1, %s397_s11 }
   0x5   : > { %s66_s17 = ssub.s32 %s401_s12, %s445_s15  ;;  %p79_p0 = scmp.ne.s32.totalorder %s397_s11, %s393_s10 }
   0x6   : > { %p67_p1 = scmp.eq.s32.totalorder %s66_s17, 0  ;;  %p80_p2 = scmp.eq.s32.totalorder %s441_s13, 1 }
   0x7   : > { %p85_p3 = scmp.ne.s32.totalorder %s393_s10, %s389_s9  ;;  %p86_p4 = scmp.eq.s32.totalorder %s275_s14, 1 }
   0x8   : > { %s456_s18 = scalar_select %p67_p1, %s397_s11, %s69_s16  }
   0x9   : > { %p458_p5 = por %p80_p2, %p79_p0  ;;  %p462_p6 = por %p86_p4, %p85_p3 }
   0xa   : > { %p278_p7 = scmp.ge.s32.totalorder %s401_s12, 1  ;;  %p115_p8 = scmp.lt.s32.totalorder %s401_s12, 3 }
   0xc   : > { %p116_p9 = pnand %p278_p7, %p115_p8 }
   0xd   : > { %v151_v0 = vld [vmem:[%s539_s1 + $0x10] sm:$0xff] (!%p116_p9)  ;;  %v149_v1 = vld [vmem:[%s539_s1] sm:$0xff] (!%p116_p9)  ;;  %v403_v2 = vmov (!%p116_p9), 0   ;;  %v152_v3 = vld [vmem:[%s539_s1 + $0x18] sm:$0xff] (!%p116_p9)  ;;  %p136_p10 = scmp.lt.s32.totalorder (!%p116_p9), %s441_s13, 1  ;;  %vm177_vm0 = vcmask (!%p116_p9), 64512  }
   0xe   : > { %119 = sbr.rel (%p116_p9) target bundleno = 502 (0x1f6), region = 28  ;;  %326 = vset.pattern.permute.xlu1 (!%p116_p9), %v403_v2  ;;  %325 = vset.pattern.permute.xlu0 (!%p116_p9), %v403_v2  ;;  %v150_v4 = vld [vmem:[%s539_s1 + $0x8] sm:$0xff] (!%p116_p9)  ;;  %s134_s6 = sand.u32 (!%p116_p9), 1, %s393_s10   ;;  %vm205_vm1 = vcmask (!%p116_p9), 57344  }
   0xf   : > { %165 = vperm.xlu1 (!%p116_p9), %326, %v151_v0   ;;  %155 = vperm.xlu0 (!%p116_p9), %325, %v149_v1   ;;  %s281_s7 = sshll.u32 (!%p116_p9), %s441_s13, 4  ;;  %s135_s8 = scalar_lea.vmem (!%p116_p9), [#allocation2], %s134_s6 }
  0x10   : > { %s220_s14 = sshll.u32 (!%p116_p9), %s135_s8, 4  ;;  %s496_s21 = scalar_lea.hbm (!%p116_p9), %s540_s2, %s281_s7  ;;  %s498_s14 = int_to_ptr.vmem [resolvable:$true] %s220_s14 }
  0x11   : > { %s208_s22 = scalar_lea.sflag (!%p116_p9), [#allocation3], %s134_s6  ;;  %s339_s23 = scalar_lea.vmem (!%p116_p9), %s498_s14, 16 }
  0x12   : > { %p340_p11 = scmp.ne.s32.totalorder (!%p116_p9), %s498_s14, %s339_s23 }
  0x13   : > { %170 = vperm.xlu1 (!%p116_p9), %326, %v152_v3   ;;  %160 = vperm.xlu0 (!%p116_p9), %325, %v150_v4  }
  0x14   : > { %p341_p12 = pnand (!%p116_p9), %p340_p11, %p458_p5 }
  0x15   : > { %s137_s29 = scalar_select %p136_p10, %s441_s13, 1 }
  0x16   : > { %p342_p13 = pneg %p341_p12  ;;  %s404_s13 = smov [#allocation2]  }
  0x17   : > { %s284_s30 = sshll.u32 %s137_s29, 5  ;;  %s343_s24 = sshll.u32 %s404_s13, 4  ;;  %s344_s24 = int_to_ptr.vmem [resolvable:$false] %s343_s24 }
  0x18   : > { %s140_s5 = scalar_lea.vmem %s538_s0, %s284_s30  ;;  %s345_s25 = scalar_lea.vmem %s344_s24, 32 }
  0x19   : > { %v141_v5 = vld [vmem:[%s140_s5] sm:$0xff]  ;;  %v143_v6 = vld [vmem:[%s140_s5 + $0x10] sm:$0xff]  ;;  %v142_v7 = vld [vmem:[%s140_s5 + $0x8] sm:$0xff]  ;;  %p346_p0 = scmp.lt.s32.totalorder %s498_s14, %s344_s24  ;;  %p347_p1 = scmp.lt.s32.totalorder %s345_s25, %s339_s23 }
  0x1a   : > { %327 = vtanh.f32 %v141_v5  ;;  %v144_v8 = vld [vmem:[%s140_s5 + $0x18] sm:$0xff] }
  0x1b   : > { %329 = vtanh.f32 %v143_v6  ;;  %p348_p2 = por %p347_p1, %p346_p0 }
  0x1c   : > { %331 = vtanh.f32 %v142_v7 }
  0x1d   : > { %333 = vtanh.f32 %v144_v8  ;;  %p349_p3 = pnand %p348_p2, %p342_p13 }
  0x24   : > { %v328_v9 = vpop.eup %327 }
  0x25   : > { %v330_v12 = vpop.eup %329 }
  0x26   : > { %v332_v13 = vpop.eup %331 }
  0x27   : > { %v334_v15 = vpop.eup %333 }
  0x8e   : > { %v166_v10 = vpop.permute.xlu1 %165  ;;  %v156_v11 = vpop.permute.xlu0 %155 }
  0x8f   : > { %v173_v14 = vmul.f32 %v328_v9, %v156_v11  ;;  %v175_v18 = vmul.f32 %v330_v12, %v166_v10 }
  0x91   : > { %v178_v20 = vsel %vm177_vm0, %v173_v14, 0.0  ;;  %v181_v24 = vsel %vm177_vm0, %v175_v18, 0.0 }
  0x92   : > { %v171_v16 = vpop.permute.xlu1 %170  ;;  %v161_v17 = vpop.permute.xlu0 %160 }
  0x93   : > { %v174_v19 = vmul.f32 %v332_v13, %v161_v17  ;;  %v176_v21 = vmul.f32 %v334_v15, %v171_v16 }
  0x95   : > { %v179_v22 = vsel %vm177_vm0, %v174_v19, 0.0  ;;  %v183_v26 = vsel %vm177_vm0, %v176_v21, 0.0 }
  0x96   : > { %v180_v23 = vadd.f32 %v179_v22, %v178_v20 }
  0x98   : > { %v182_v25 = vadd.f32 %v181_v24, %v180_v23 }
  0x9a   : > { %v184_v27 = vadd.f32 %v183_v26, %v182_v25 }
  0x9c   : > { %v185_v28 = vrot.slane %v184_v27, 4 }
  0x9e   : > { %v186_v29 = vadd.f32 %v185_v28, %v184_v27 }
  0xa0   : > { %v187_v30 = vrot.slane %v186_v29, 2 }
  0xa2   : > { %v188_v31 = vadd.f32 %v187_v30, %v186_v29 }
  0xa4   : > { %v189_v32 = vrot.slane %v188_v31, 1 }
  0xa6   : > { %v190_v33 = vadd.f32 %v189_v32, %v188_v31 }
  0xa8   : > { %v191_v34 = vsel %vm177_vm0, %v190_v33, -inf }
  0xa9   : > { %192 = vmax.xlane.f32.xlu0 %v191_v34 }
 0x136   : > { %v193_v35 = vpop.xlane.xlu0 %192 }
 0x137   : > { %v194_v36 = vsub.f32 %v190_v33, %v193_v35 }
 0x139   : > { %v195_v37 = vmul.f32 1.442695, %v194_v36 }
 0x13b   : > { %335 = vpow2.f32 %v195_v37 }
 0x145   : > { %v336_v38 = vpop.eup %335 }
 0x146   : > { %v197_v39 = vsel %vm177_vm0, %v336_v38, 0.0 }
 0x147   : > { %198 = vadd.xlane.f32.xlu1 %v197_v39 }
 0x1d4   : > { %v199_v40 = vpop.xlane.xlu1 %198 }
 0x1d5   : > { %337 = vrcp.f32 %v199_v40 }
 0x1df   : > { %v338_v41 = vpop.eup %337 }
 0x1e0   : > { %v201_v42 = vmul.f32 %v338_v41, %v199_v40 }
 0x1e2   : > { %v202_v43 = vsub.f32 2.0, %v201_v42 }
 0x1e4   : > { %v203_v44 = vmul.f32 %v338_v41, %v202_v43 }
 0x1e6   : > { %v204_v45 = vmul.f32 %v336_v38, %v203_v44 }
 0x1e8   : > { %206 = vst.msk [vmem:[%s135_s8] sm:$0x1] %vm205_vm1, %v204_v45 }
 0x1e9   : > { %352 = shalt.err (!%p349_p3)
}
 0x1ea   : > { %s353_s26 = scalar_lea.hbm %s496_s21, 16  ;;  %s357_s29 = scalar_lea.hbm %s540_s2, 32 }
 0x1eb   : > { %p354_p4 = scmp.ne.s32.totalorder %s496_s21, %s353_s26  ;;  %p358_p9 = scmp.lt.u32.totalorder %s496_s21, %s540_s2 }
 0x1ec   : > { %p359_p10 = scmp.lt.u32.totalorder %s357_s29, %s353_s26  ;;  %p361_p12 = scmp.lt.u32.totalorder %s353_s26, %s496_s21 }
 0x1ed   : > { %p355_p7 = pnand %p354_p4, %p458_p5 }
 0x1ee   : > { %p360_p11 = por %p359_p10, %p358_p9 }
 0x1ef   : > { %p356_p8 = pneg %p355_p7 }
 0x1f0   : > { %p362_p13 = por %p361_p12, %p360_p11 }
 0x1f2   : > { %p363_p0 = pnand %p362_p13, %p356_p8 }
 0x1f4   : > { %366 = shalt.err (!%p363_p0)
}
 0x1f5   : > { %285 = dma.vmem_to_hbm [thread:$0]  (%p458_p5), %s498_s14, 16, %s496_s21, %s208_s22  }
 0x1f6 PF: > { %p291_p1 = scmp.ge.s32.totalorder %s401_s12, 2  ;;  %s232_s4 = sand.u32 1, %s389_s9  }
 0x1f7   : > { %s233_s5 = scalar_lea.sflag [#allocation3], %s232_s4 }
 0x1f8   : > { %p288_p2 = pnand %p291_p1, %p462_p6 }
 0x1fa   : > { %384 = dma.done.wait (!%p288_p2), %s233_s5, 16  }
 0x1fb   : > { %386 = vsyncadd (!%p288_p2), %s233_s5, 4294967280  ;;  %p12_p3 = scmp.ge.s32.totalorder %s445_s15, 4   ;;  %s543_s9 = smov %s393_s10 }
 0x1fc   : > { %s544_s10 = smov %s397_s11  ;;  %s545_s11 = smov %s456_s18 }
 0x1fd   : > { %s546_s12 = smov %s445_s15  ;;  %14 = sbr.rel (!%p12_p3) target bundleno = 3 (0x3), region = 63 }
 0x204   :  { %237 = vsyncpa [#allocation3], 1 }
 0x205   :  { %239 = vsyncpa [#allocation3 + $0x1], 1 }

</bundles_post_ra>
